<compile_context>
chip_gen: v7x
topology: tpu7x:2x2x1
jax: 0.10.0
libtpu: 0.0.40
codegen_flags: <defaults>
</compile_context>

<pallas_src>
import functools

import jax
import jax.numpy as jnp
from jax.experimental import pallas as pl
from jax.experimental.pallas import tpu as pltpu

_SUBLANE = 8
_MIB = 1024 * 1024


def _round_up(x: int, m: int) -> int:
    return ((x + m - 1) // m) * m


def _make_mlp_kernel(n_layers: int, tanh_flags: tuple):
    """Fused MLP kernel: refs = (x, w0, b0, w1, b1, ..., out)."""

    def kernel(*refs):
        x_ref = refs[0]
        o_ref = refs[-1]
        h = x_ref[...].astype(jnp.float32)
        for li in range(n_layers):
            w = refs[1 + 2 * li][...]
            b = refs[2 + 2 * li][...]
            # bf16 weights -> bf16 MXU operands with f32 accumulation;
            # f32 weights -> plain f32 matmul (exact path).
            lhs = h if w.dtype == jnp.float32 else h.astype(w.dtype)
            y = jnp.dot(lhs, w, preferred_element_type=jnp.float32)
            # Bias add + tanh epilogue in f32 (v5e has no bf16 VPU/EUP).
            y = y + b.astype(jnp.float32)
            if tanh_flags[li]:
                y = jnp.tanh(y)
            h = y
        o_ref[...] = h.astype(o_ref.dtype)

    return kernel


def prepare_dnn_params(params, matmul_dtype=jnp.float32):
    """One-time parameter preparation (do NOT repeat per forward call).

    Casts weights to the MXU operand dtype (bf16 recommended on v6e/v7x,
    optional on v5e); biases stay f32 for the f32 epilogue.
    """
    return [(w.astype(matmul_dtype), b.astype(jnp.float32)) for (w, b) in params]


@functools.partial(jax.jit, static_argnames=("activation", "tile_m"))
def dnn_forward(x, params, *, activation: bool = True, tile_m: int = 512):
    """Full DNN forward in one fused Pallas kernel.

    x: (B, in_features); params = [(w0, b0), ..., (wL, bL)] with
    w: (in_f, out_f) (already transposed vs. torch) and b: (1, out_f).
    Tanh after every layer except the last; Dropout(p=0.0) is identity.
    """
    n_layers = len(params)
    B, in_f = x.shape
    out_f = params[-1][0].shape[1]
    tanh_flags = tuple(activation and (li != n_layers - 1)
                       for li in range(n_layers))

    # --- batch tiling (no feature padding; ragged last tile allowed) -------
    tm = min(_round_up(tile_m, _SUBLANE), _round_up(B, _SUBLANE))
    if B > _SUBLANE and pl.cdiv(B, tm) < 2:
        # Ensure >= 2 grid steps so v7x's two TensorCores both get work under
        # dimension_semantics=("parallel",).
        tm = _round_up(pl.cdiv(B, 2), _SUBLANE)
    grid_m = pl.cdiv(B, tm)

    # --- block specs: batch-tiled activations, single-buffered residents ---
    in_specs = [pl.BlockSpec((tm, in_f), lambda i: (i, 0))]
    for (w, bvec) in params:
        in_specs.append(
            pl.BlockSpec(w.shape, lambda i: (0, 0),
                         pipeline_mode=pl.Buffered(buffer_count=1)))
        in_specs.append(
            pl.BlockSpec(bvec.shape, lambda i: (0, 0),
                         pipeline_mode=pl.Buffered(buffer_count=1)))
    out_spec = pl.BlockSpec((tm, out_f), lambda i: (i, 0))

    # --- VMEM budget & advisory cost estimate (per-array itemsizes) --------
    itemsize_x = jnp.dtype(x.dtype).itemsize
    param_bytes = sum(
        w.size * jnp.dtype(w.dtype).itemsize
        + b.size * jnp.dtype(b.dtype).itemsize
        for (w, b) in params)
    max_width = max([in_f] + [w.shape[1] for (w, _) in params])
    vmem_need = (2 * tm * in_f * itemsize_x           # double-buffered x tile
                 + 2 * tm * out_f * itemsize_x        # double-buffered out tile
                 + param_bytes                        # single-buffered weights
                 + 4 * tm * max_width * 4)            # f32 running activation
    vmem_limit = int(min(max(2 * vmem_need, 32 * _MIB), 64 * _MIB))

    flops = 2 * B * sum(w.shape[0] * w.shape[1] for (w, _) in params)
    transcendentals = B * sum(
        w.shape[1] for (w, _), t in zip(params, tanh_flags) if t)
    bytes_accessed = (x.size * itemsize_x + param_bytes + B * out_f * itemsize_x)

    flat_inputs = [x]
    for (w, bvec) in params:
        flat_inputs.extend([w, bvec])

    kernel = _make_mlp_kernel(n_layers, tanh_flags)
    return pl.pallas_call(
        kernel,
        out_shape=jax.ShapeDtypeStruct((B, out_f), x.dtype),
        grid=(grid_m,),
        in_specs=in_specs,
        out_specs=out_spec,
        compiler_params=pltpu.CompilerParams(
            dimension_semantics=("parallel",),
            vmem_limit_bytes=vmem_limit,
        ),
        cost_estimate=pl.CostEstimate(
            flops=int(flops),
            transcendentals=int(transcendentals),
            bytes_accessed=int(bytes_accessed),
        ),
    )(*flat_inputs)


def init_dnn_params(key, in_features, hidden_sizes, out_features,
                    dtype=jnp.float32):
    """Deterministic init mimicking nn.Linear's U(-1/sqrt(fan_in), +...)."""
    sizes = [in_features] + list(hidden_sizes) + [out_features]
    params = []
    for fan_in, fan_out in zip(sizes[:-1], sizes[1:]):
        key, kw, kb = jax.random.split(key, 3)
        bound = 1.0 / (fan_in ** 0.5)
        # stored as (in_f, out_f): already transposed vs. torch's (out_f, in_f)
        w = jax.random.uniform(kw, (fan_in, fan_out), dtype,
                               minval=-bound, maxval=bound)
        b = jax.random.uniform(kb, (1, fan_out), dtype,
                               minval=-bound, maxval=bound)
        params.append((w, b))
    return params


def dnn_forward_ref(x, params, *, activation: bool = True):
    """Pure-JAX reference for sanity checking."""
    n_layers = len(params)
    h = x
    for li, (w, b) in enumerate(params):
        h = h @ w + b
        if activation and li != n_layers - 1:
            h = jnp.tanh(h)
    return h


if __name__ == "__main__":
    key = jax.random.PRNGKey(0)
    kx, kx2, kp = jax.random.split(key, 3)

    batch = 8
    in_features = 4
    hidden_sizes = [32, 32]
    out_features = 2

    params = init_dnn_params(kp, in_features, hidden_sizes, out_features)
    params_f32 = prepare_dnn_params(params, jnp.float32)     # exact path
    params_bf16 = prepare_dnn_params(params, jnp.bfloat16)   # MXU-native weights

    # Small-batch check (single grid step, fused kernel).
    x = jax.random.normal(kx, (batch, in_features), jnp.float32)
    out = jax.block_until_ready(dnn_forward(x, params_f32, activation=True))
    ref = dnn_forward_ref(x, params, activation=True)
    assert out.shape == (batch, out_features)
    assert jnp.allclose(out, ref, atol=1e-5, rtol=1e-5)

    # Larger, non-multiple batch: ragged last tile + >=2 parallel grid steps.
    x2 = jax.random.normal(kx2, (300, in_features), jnp.float32)
    out2 = jax.block_until_ready(dnn_forward(x2, params_f32, activation=True))
    ref2 = dnn_forward_ref(x2, params, activation=True)
    assert out2.shape == (300, out_features)
    assert jnp.allclose(out2, ref2, atol=1e-5, rtol=1e-5)
    assert bool(jnp.all(jnp.isfinite(out2)))

    # bf16-weight MXU path (f32 activations / accumulation / epilogue).
    out3 = jax.block_until_ready(dnn_forward(x2, params_bf16, activation=True))
    assert out3.shape == (300, out_features)
    assert jnp.allclose(out3, ref2, atol=1e-1, rtol=1e-1)

    # Linear mode (activation=False) of the module.
    out4 = jax.block_until_ready(dnn_forward(x, params_f32, activation=False))
    ref4 = dnn_forward_ref(x, params, activation=False)
    assert jnp.allclose(out4, ref4, atol=1e-5, rtol=1e-5)

    print("KERNEL_OK")
</pallas_src>

<mosaic_0001>
module attributes {stable_mosaic.version = 11 : i64} {
  func.func @kernel(%arg0: i32, %arg1: memref<8x4xf32, #tpu.memory_space<vmem>>, %arg2: memref<4x32xf32, #tpu.memory_space<vmem>>, %arg3: memref<1x32xf32, #tpu.memory_space<vmem>>, %arg4: memref<32x32xf32, #tpu.memory_space<vmem>>, %arg5: memref<1x32xf32, #tpu.memory_space<vmem>>, %arg6: memref<32x2xf32, #tpu.memory_space<vmem>>, %arg7: memref<1x2xf32, #tpu.memory_space<vmem>>, %arg8: memref<8x2xf32, #tpu.memory_space<vmem>>) attributes {dimension_semantics = [#tpu.dimension_semantics<parallel>], iteration_bounds = array<i64: 1>, scalar_prefetch = 0 : i64, scratch_operands = 0 : i64, tpu.core_type = #tpu.core_type<tc>, window_params = [{transform_indices = @transform_0, window_bounds = array<i64: 8, 4>}, {pipeline_mode = #tpu.pipeline_mode<synchronous>, transform_indices = @transform_1, window_bounds = array<i64: 4, 32>}, {pipeline_mode = #tpu.pipeline_mode<synchronous>, transform_indices = @transform_2, window_bounds = array<i64: 1, 32>}, {pipeline_mode = #tpu.pipeline_mode<synchronous>, transform_indices = @transform_3, window_bounds = array<i64: 32, 32>}, {pipeline_mode = #tpu.pipeline_mode<synchronous>, transform_indices = @transform_4, window_bounds = array<i64: 1, 32>}, {pipeline_mode = #tpu.pipeline_mode<synchronous>, transform_indices = @transform_5, window_bounds = array<i64: 32, 2>}, {pipeline_mode = #tpu.pipeline_mode<synchronous>, transform_indices = @transform_6, window_bounds = array<i64: 1, 2>}, {transform_indices = @transform_7, window_bounds = array<i64: 8, 2>}]} {
    %c0 = arith.constant 0 : index
    %c0_0 = arith.constant 0 : index
    %0 = vector.load %arg1[%c0, %c0_0] : memref<8x4xf32, #tpu.memory_space<vmem>>, vector<8x4xf32>
    %c0_1 = arith.constant 0 : index
    %c0_2 = arith.constant 0 : index
    %1 = vector.load %arg2[%c0_1, %c0_2] : memref<4x32xf32, #tpu.memory_space<vmem>>, vector<4x32xf32>
    %c0_3 = arith.constant 0 : index
    %c0_4 = arith.constant 0 : index
    %2 = vector.load %arg3[%c0_3, %c0_4] : memref<1x32xf32, #tpu.memory_space<vmem>>, vector<1x32xf32>
    %cst = arith.constant dense<0.000000e+00> : vector<8x32xf32>
    %3 = tpu.matmul %0, %1, %cst {dimension_numbers = #tpu.dot_dimension_numbers<[1], [0], [0], [1], [0, 0, 1, 1], [], []>} : vector<8x4xf32>, vector<4x32xf32>, vector<8x32xf32> -> vector<8x32xf32>
    %4 = vector.broadcast %2 : vector<1x32xf32> to vector<8x32xf32>
    %5 = arith.addf %3, %4 : vector<8x32xf32>
    %6 = math.tanh %5 : vector<8x32xf32>
    %c0_5 = arith.constant 0 : index
    %c0_6 = arith.constant 0 : index
    %7 = vector.load %arg4[%c0_5, %c0_6] : memref<32x32xf32, #tpu.memory_space<vmem>>, vector<32x32xf32>
    %c0_7 = arith.constant 0 : index
    %c0_8 = arith.constant 0 : index
    %8 = vector.load %arg5[%c0_7, %c0_8] : memref<1x32xf32, #tpu.memory_space<vmem>>, vector<1x32xf32>
    %cst_9 = arith.constant dense<0.000000e+00> : vector<8x32xf32>
    %9 = tpu.matmul %6, %7, %cst_9 {dimension_numbers = #tpu.dot_dimension_numbers<[1], [0], [0], [1], [0, 0, 1, 1], [], []>} : vector<8x32xf32>, vector<32x32xf32>, vector<8x32xf32> -> vector<8x32xf32>
    %10 = vector.broadcast %8 : vector<1x32xf32> to vector<8x32xf32>
    %11 = arith.addf %9, %10 : vector<8x32xf32>
    %12 = math.tanh %11 : vector<8x32xf32>
    %c0_10 = arith.constant 0 : index
    %c0_11 = arith.constant 0 : index
    %13 = vector.load %arg6[%c0_10, %c0_11] : memref<32x2xf32, #tpu.memory_space<vmem>>, vector<32x2xf32>
    %c0_12 = arith.constant 0 : index
    %c0_13 = arith.constant 0 : index
    %14 = vector.load %arg7[%c0_12, %c0_13] : memref<1x2xf32, #tpu.memory_space<vmem>>, vector<1x2xf32>
    %cst_14 = arith.constant dense<0.000000e+00> : vector<8x2xf32>
    %15 = tpu.matmul %12, %13, %cst_14 {dimension_numbers = #tpu.dot_dimension_numbers<[1], [0], [0], [1], [0, 0, 1, 1], [], []>} : vector<8x32xf32>, vector<32x2xf32>, vector<8x2xf32> -> vector<8x2xf32>
    %16 = vector.broadcast %14 : vector<1x2xf32> to vector<8x2xf32>
    %17 = arith.addf %15, %16 : vector<8x2xf32>
    %c0_15 = arith.constant 0 : index
    %c0_16 = arith.constant 0 : index
    %18 = vector.load %arg8[%c0_15, %c0_16] : memref<8x2xf32, #tpu.memory_space<vmem>>, vector<8x2xf32>
    tpu.vector_store %arg8[%c0_15, %c0_16], %17 {strides = array<i32>} : memref<8x2xf32, #tpu.memory_space<vmem>>, vector<8x2xf32>,
    return
  }
  func.func @transform_0(%arg0: i32) -> (i32, i32) {
    %c0_i32 = arith.constant 0 : i32
    %c0_i32_0 = arith.constant 0 : i32
    return %arg0, %c0_i32 : i32, i32
  }
  func.func @transform_1(%arg0: i32) -> (i32, i32) {
    %c0_i32 = arith.constant 0 : i32
    %c0_i32_0 = arith.constant 0 : i32
    %c0_i32_1 = arith.constant 0 : i32
    return %c0_i32, %c0_i32_0 : i32, i32
  }
  func.func @transform_2(%arg0: i32) -> (i32, i32) {
    %c0_i32 = arith.constant 0 : i32
    %c0_i32_0 = arith.constant 0 : i32
    %c0_i32_1 = arith.constant 0 : i32
    return %c0_i32, %c0_i32_0 : i32, i32
  }
  func.func @transform_3(%arg0: i32) -> (i32, i32) {
    %c0_i32 = arith.constant 0 : i32
    %c0_i32_0 = arith.constant 0 : i32
    %c0_i32_1 = arith.constant 0 : i32
    return %c0_i32, %c0_i32_0 : i32, i32
  }
  func.func @transform_4(%arg0: i32) -> (i32, i32) {
    %c0_i32 = arith.constant 0 : i32
    %c0_i32_0 = arith.constant 0 : i32
    %c0_i32_1 = arith.constant 0 : i32
    return %c0_i32, %c0_i32_0 : i32, i32
  }
  func.func @transform_5(%arg0: i32) -> (i32, i32) {
    %c0_i32 = arith.constant 0 : i32
    %c0_i32_0 = arith.constant 0 : i32
    %c0_i32_1 = arith.constant 0 : i32
    return %c0_i32, %c0_i32_0 : i32, i32
  }
  func.func @transform_6(%arg0: i32) -> (i32, i32) {
    %c0_i32 = arith.constant 0 : i32
    %c0_i32_0 = arith.constant 0 : i32
    %c0_i32_1 = arith.constant 0 : i32
    return %c0_i32, %c0_i32_0 : i32, i32
  }
  func.func @transform_7(%arg0: i32) -> (i32, i32) {
    %c0_i32 = arith.constant 0 : i32
    %c0_i32_0 = arith.constant 0 : i32
    return %arg0, %c0_i32 : i32, i32
  }
}

</mosaic_0001>

<bundles_post_ra>
// kernel: dnn_forward.1
= control target key start
LH: loop header
LB: loop body
LE: loop exit
PB: predicated region body
PF: predicated region fallthrough
CT: control target
= control target key end

     0   :  { %vm39_vm0 = vcmask 1043456   ;;  %vm35_vm1 = vcmask 31744   ;;  %v355_v0 = vmov 0.0   ;;  %vm356_vm2 = vmmov 0   ;;  %s442_s1 = inlined_call_operand.vmem [shape: f32[4,32], index: 1, kind: input, shape index: {}]   ;;  %s443_s0 = inlined_call_operand.vmem [shape: f32[8,4], index: 0, kind: input, shape index: {}]   ;;  %s444_s3 = inlined_call_operand.vmem [shape: f32[32,32], index: 3, kind: input, shape index: {}]   ;;  %s445_s2 = inlined_call_operand.vmem [shape: f32[1,32], index: 2, kind: input, shape index: {}]   ;;  %s446_s5 = inlined_call_operand.vmem [shape: f32[32,2], index: 5, kind: input, shape index: {}]   ;;  %s447_s4 = inlined_call_operand.vmem [shape: f32[1,32], index: 4, kind: input, shape index: {}]   ;;  %s448_s6 = inlined_call_operand.vmem [shape: f32[1,2], index: 6, kind: input, shape index: {}]   ;;  %s449_s7 = inlined_call_operand.vmem [shape: f32[8,2], index: 7, kind: output, shape index: {}]  }
   0x1   :  { %309 = vmatprep.subr.mxu0 %v355_v0  ;;  %v27_v1 = vld [vmem:[%s442_s1] sm:$0xf]  ;;  %311 = vmatprep.mubr.msk.f32.mxu0 %vm356_vm2, %v355_v0  ;;  %v357_v3 = vmov 0.0|0.0   ;;  %v115_v5 = vld [vmem:[%s444_s3 + $0x8] sm:$0xff]  ;;  %v116_v6 = vld [vmem:[%s444_s3 + $0x10] sm:$0xff]  ;;  %vm125_vm3 = vcmask 261120  }
   0x2   :  { %v26_v2 = vld [vmem:[%s443_s0] sm:$0xff]  ;;  %310 = vmatpush3.msk.msra.mxu0 %vm39_vm0, %v27_v1  ;;  %322 = vmatprep.mubr.msk.f32.mxu1 %vm356_vm2, %v355_v0  ;;  %v117_v8 = vld [vmem:[%s444_s3 + $0x18] sm:$0xff]  ;;  %v201_v16 = vld [vmem:[%s446_s5 + $0x8] sm:$0xff]  ;;  %vm284_vm4 = vcmask 15360  }
   0x3   :  { %312 = vmatmul.mubr.msk.f32.vlgmr.msra.gmra.mrb[0].mxu0 %vm35_vm1, %v26_v2  ;;  %336 = vmatprep.subr.bf16.mxu1 %v357_v3  ;;  %v114_v4 = vld [vmem:[%s444_s3] sm:$0xff]  ;;  %v340_v9 = vpack.c.bf16 %v117_v8, %v116_v6  ;;  %v202_v17 = vld [vmem:[%s446_s5 + $0x10] sm:$0xff]  ;;  %v203_v19 = vld [vmem:[%s446_s5 + $0x18] sm:$0xff] }
   0x4   :  { %333 = vmatprep.mubr.msk.f32.mxu0 %vm356_vm2, %v355_v0  ;;  %342 = vmatprep.subr.bf16.mxu0 %v357_v3  ;;  %v337_v7 = vpack.c.bf16 %v115_v5, %v114_v4  ;;  %v290_v10 = vld [vmem:[%s445_s2] ss:$0 sm:$0xff]  ;;  %v346_v20 = vpack.c.bf16 %v203_v19, %v202_v17 }
   0x5   :  { %v200_v15 = vld [vmem:[%s446_s5] sm:$0xff] }
   0x6   :  { %338 = vmatpush3.bf16.msra.mxu1 %v337_v7  ;;  %v343_v18 = vpack.c.bf16 %v201_v16, %v200_v15  ;;  %v293_v21 = vld [vmem:[%s447_s4] ss:$0 sm:$0xff] }
   0x7   :  { %339 = vmatprep.subr.bf16.mxu1 %v357_v3  ;;  %v295_v26 = vld [vmem:[%s448_s6] ss:$0 sm:$0xff] }
   0x8   :  { %344 = vmatpush3.bf16.msra.mxu0 %v343_v18 }
   0x9   :  { %345 = vmatprep.subr.bf16.mxu0 %v357_v3 }
   0xa   :  { %341 = vmatpush3.bf16.msra.mxu1 %v340_v9 }
   0xc   :  { %347 = vmatpush3.bf16.msra.mxu0 %v346_v20 }
  0xd6   :  { %v109_v11 = vpop.f32.mrb[0].mxu0 }
  0xd7   :  { %v110_v12 = vadd.f32 %v290_v10, %v109_v11  ;;  %v313_v13 = vpop.f32.mrb[1].mxu0 }
  0xd9   :  { %351 = vtanh.f32 %v110_v12 }
  0xe3   :  { %v352_v14 = vpop.eup %351 }
  0xe4   :  { %323 = vmatmul.mubr.msk.f32.vlgmr.msra.gmra.mrb[0].mxu1 %vm125_vm3, %v352_v14 }
 0x1b7   :  { %v195_v22 = vpop.f32.mrb[0].mxu1 }
 0x1b8   :  { %v196_v23 = vadd.f32 %v293_v21, %v195_v22  ;;  %v324_v24 = vpop.f32.mrb[1].mxu1 }
 0x1ba   :  { %353 = vtanh.f32 %v196_v23 }
 0x1c4   :  { %v354_v25 = vpop.eup %353 }
 0x1c5   :  { %334 = vmatmul.mubr.msk.f32.vlgmr.msra.gmra.mrb[2].mxu0 %vm125_vm3, %v354_v25 }
 0x298   :  { %v280_v27 = vpop.f32.mrb[2].mxu0 }
 0x299   :  { %v281_v28 = vadd.f32 %v295_v26, %v280_v27  ;;  %v335_v29 = vpop.f32.mrb[3].mxu0 }
 0x29b   :  { %285 = vst.msk [vmem:[%s449_s7] sm:$0xff] %vm284_vm4, %v281_v28 }

</bundles_post_ra>
